<compile_context>
chip_gen: v5e
topology: v5e:2x2
jax: 0.10.0
libtpu: 0.0.40
codegen_flags: <defaults>
</compile_context>

<pallas_src>
import math

import jax
import jax.numpy as jnp
from jax.experimental import pallas as pl
from jax.experimental.pallas import tpu as pltpu

MXU_LANES = 128   # final-layer matmul width kept lane-dense in VMEM
OUT_PAD = 8       # lanes actually written back to HBM (true output is 2)
OUT_TRUE = 2


def _round_up(n, m):
    return ((n + m - 1) // m) * m


def mouse_net_kernel(x_ref, w1_ref, b1_ref, w2_ref, b2_ref,
                     w3_ref, b3_ref, w4_ref, b4_ref, o_ref):
    # x block: (BT, 10) -> bf16 for the MXU (no-op if caller already passes bf16);
    # accumulate every layer in f32, ReLU in f32, re-cast activations to bf16.
    x = x_ref[...].astype(jnp.bfloat16)
    h = jnp.dot(x, w1_ref[...], preferred_element_type=jnp.float32) + b1_ref[...]
    h = jnp.maximum(h, 0.0).astype(jnp.bfloat16)
    h = jnp.dot(h, w2_ref[...], preferred_element_type=jnp.float32) + b2_ref[...]
    h = jnp.maximum(h, 0.0).astype(jnp.bfloat16)
    h = jnp.dot(h, w3_ref[...], preferred_element_type=jnp.float32) + b3_ref[...]
    h = jnp.maximum(h, 0.0).astype(jnp.bfloat16)
    # Layer 4: zero-padded (64, 128) weight keeps the MXU result lane-dense in
    # VMEM; only the first OUT_PAD lanes are DMA'd back to HBM.
    y = jnp.dot(h, w4_ref[...], preferred_element_type=jnp.float32) + b4_ref[...]
    o_ref[...] = y[:, :OUT_PAD].astype(o_ref.dtype)


def mouse_net_forward(x, params, *, block_batch=2048):
    """x: (B, 10) float (f32 or bf16). params: weights (in,out) f32, biases (1,out) f32."""
    B, F_in = x.shape
    assert F_in == 10

    # --- one-time param prep: bf16 weights, lane-padded final layer ----------
    w1 = params["w1"].astype(jnp.bfloat16)
    w2 = params["w2"].astype(jnp.bfloat16)
    w3 = params["w3"].astype(jnp.bfloat16)
    w4 = jnp.pad(params["w4"],
                 ((0, 0), (0, MXU_LANES - params["w4"].shape[1]))).astype(jnp.bfloat16)
    b1 = params["b1"]
    b2 = params["b2"]
    b3 = params["b3"]
    b4 = jnp.pad(params["b4"], ((0, 0), (0, MXU_LANES - params["b4"].shape[1])))

    # --- batch tiling: fewest grid steps possible, >=2 steps when splittable ---
    b8 = _round_up(B, 8)
    n_steps = max(1, -(-b8 // block_batch))
    if n_steps == 1 and b8 >= 16:
        n_steps = 2                      # give v7x's 2nd TensorCore work
    bt = _round_up(-(-b8 // n_steps), 8)  # sublane-aligned batch tile
    b_pad = bt * n_steps
    if b_pad != B:
        x = jnp.pad(x, ((0, b_pad - B), (0, 0)))
    grid = (n_steps,)

    # x / out are pipelined over the grid; weights & biases stay VMEM-resident.
    x_spec = pl.BlockSpec((bt, 10), lambda i: (i, 0))
    out_spec = pl.BlockSpec((bt, OUT_PAD), lambda i: (i, 0))

    def const_spec(arr):
        return pl.BlockSpec(arr.shape, lambda i: (0, 0))

    weight_args = (w1, b1, w2, b2, w3, b3, w4, b4)
    in_specs = [x_spec] + [const_spec(a) for a in weight_args]

    flops = 2 * b_pad * (10 * 128 + 128 * 128 + 128 * 64 + 64 * MXU_LANES)
    bytes_accessed = (b_pad * 10 * x.dtype.itemsize
                      + b_pad * OUT_PAD * 4
                      + sum(int(a.size) * a.dtype.itemsize for a in weight_args))

    out_padded = pl.pallas_call(
        mouse_net_kernel,
        out_shape=jax.ShapeDtypeStruct((b_pad, OUT_PAD), jnp.float32),
        grid=grid,
        in_specs=in_specs,
        out_specs=out_spec,
        compiler_params=pltpu.CompilerParams(
            dimension_semantics=("parallel",),
            vmem_limit_bytes=48 << 20),
        cost_estimate=pl.CostEstimate(
            flops=flops, transcendentals=0, bytes_accessed=bytes_accessed),
    )(x, *weight_args)

    return out_padded[:B, :OUT_TRUE]


def init_params(key):
    """Deterministic PyTorch-style init: U(-1/sqrt(fan_in), 1/sqrt(fan_in))."""
    dims = [(10, 128), (128, 128), (128, 64), (64, 2)]
    params = {}
    for i, (fan_in, fan_out) in enumerate(dims, start=1):
        key, kw, kb = jax.random.split(key, 3)
        bound = 1.0 / math.sqrt(fan_in)
        params[f"w{i}"] = jax.random.uniform(
            kw, (fan_in, fan_out), jnp.float32, -bound, bound)
        params[f"b{i}"] = jax.random.uniform(
            kb, (1, fan_out), jnp.float32, -bound, bound)
    return params


def reference_forward(x, params):
    h = jnp.maximum(x @ params["w1"] + params["b1"], 0.0)
    h = jnp.maximum(h @ params["w2"] + params["b2"], 0.0)
    h = jnp.maximum(h @ params["w3"] + params["b3"], 0.0)
    return h @ params["w4"] + params["b4"]


if __name__ == "__main__":
    key = jax.random.PRNGKey(0)
    key, kx = jax.random.split(key)
    B = 8
    x = jax.random.normal(kx, (B, 10), jnp.float32)
    params = init_params(key)

    out = mouse_net_forward(x, params)
    out = jax.block_until_ready(out)

    ref = reference_forward(x, params)
    assert out.shape == (B, OUT_TRUE), out.shape
    # bf16 MXU operands => loosened tolerance vs the f32 reference.
    assert jnp.allclose(out, ref, atol=5e-2, rtol=5e-2), "mismatch vs reference"

    print("KERNEL_OK")
</pallas_src>

<mosaic_0001>
module attributes {stable_mosaic.version = 11 : i64} {
  func.func @mouse_net_kernel(%arg0: i32, %arg1: memref<8x10xf32, #tpu.memory_space<vmem>>, %arg2: memref<10x128xbf16, #tpu.memory_space<vmem>>, %arg3: memref<1x128xf32, #tpu.memory_space<vmem>>, %arg4: memref<128x128xbf16, #tpu.memory_space<vmem>>, %arg5: memref<1x128xf32, #tpu.memory_space<vmem>>, %arg6: memref<128x64xbf16, #tpu.memory_space<vmem>>, %arg7: memref<1x64xf32, #tpu.memory_space<vmem>>, %arg8: memref<64x128xbf16, #tpu.memory_space<vmem>>, %arg9: memref<1x128xf32, #tpu.memory_space<vmem>>, %arg10: memref<8x8xf32, #tpu.memory_space<vmem>>) attributes {dimension_semantics = [#tpu.dimension_semantics<parallel>], iteration_bounds = array<i64: 1>, scalar_prefetch = 0 : i64, scratch_operands = 0 : i64, tpu.core_type = #tpu.core_type<tc>, window_params = [{transform_indices = @transform_0, window_bounds = array<i64: 8, 10>}, {pipeline_mode = #tpu.pipeline_mode<synchronous>, transform_indices = @transform_1, window_bounds = array<i64: 10, 128>}, {pipeline_mode = #tpu.pipeline_mode<synchronous>, transform_indices = @transform_2, window_bounds = array<i64: 1, 128>}, {pipeline_mode = #tpu.pipeline_mode<synchronous>, transform_indices = @transform_3, window_bounds = array<i64: 128, 128>}, {pipeline_mode = #tpu.pipeline_mode<synchronous>, transform_indices = @transform_4, window_bounds = array<i64: 1, 128>}, {pipeline_mode = #tpu.pipeline_mode<synchronous>, transform_indices = @transform_5, window_bounds = array<i64: 128, 64>}, {pipeline_mode = #tpu.pipeline_mode<synchronous>, transform_indices = @transform_6, window_bounds = array<i64: 1, 64>}, {pipeline_mode = #tpu.pipeline_mode<synchronous>, transform_indices = @transform_7, window_bounds = array<i64: 64, 128>}, {pipeline_mode = #tpu.pipeline_mode<synchronous>, transform_indices = @transform_8, window_bounds = array<i64: 1, 128>}, {transform_indices = @transform_9, window_bounds = array<i64: 8, 8>}]} {
    %c0 = arith.constant 0 : index
    %c0_0 = arith.constant 0 : index
    %0 = vector.load %arg1[%c0, %c0_0] : memref<8x10xf32, #tpu.memory_space<vmem>>, vector<8x10xf32>
    %1 = arith.truncf %0 : vector<8x10xf32> to vector<8x10xbf16>
    %c0_1 = arith.constant 0 : index
    %c0_2 = arith.constant 0 : index
    %2 = vector.load %arg2[%c0_1, %c0_2] : memref<10x128xbf16, #tpu.memory_space<vmem>>, vector<10x128xbf16>
    %cst = arith.constant dense<0.000000e+00> : vector<8x128xf32>
    %3 = tpu.matmul %1, %2, %cst {dimension_numbers = #tpu.dot_dimension_numbers<[1], [0], [0], [1], [0, 0, 1, 1], [], []>} : vector<8x10xbf16>, vector<10x128xbf16>, vector<8x128xf32> -> vector<8x128xf32>
    %c0_3 = arith.constant 0 : index
    %c0_4 = arith.constant 0 : index
    %4 = vector.load %arg3[%c0_3, %c0_4] : memref<1x128xf32, #tpu.memory_space<vmem>>, vector<1x128xf32>
    %5 = vector.broadcast %4 : vector<1x128xf32> to vector<8x128xf32>
    %6 = arith.addf %3, %5 : vector<8x128xf32>
    %cst_5 = arith.constant 0.000000e+00 : f32
    %7 = vector.broadcast %cst_5 : f32 to vector<8x128xf32>
    %8 = arith.maximumf %6, %7 : vector<8x128xf32>
    %9 = arith.truncf %8 : vector<8x128xf32> to vector<8x128xbf16>
    %c0_6 = arith.constant 0 : index
    %c0_7 = arith.constant 0 : index
    %10 = vector.load %arg4[%c0_6, %c0_7] : memref<128x128xbf16, #tpu.memory_space<vmem>>, vector<128x128xbf16>
    %cst_8 = arith.constant dense<0.000000e+00> : vector<8x128xf32>
    %11 = tpu.matmul %9, %10, %cst_8 {dimension_numbers = #tpu.dot_dimension_numbers<[1], [0], [0], [1], [0, 0, 1, 1], [], []>} : vector<8x128xbf16>, vector<128x128xbf16>, vector<8x128xf32> -> vector<8x128xf32>
    %c0_9 = arith.constant 0 : index
    %c0_10 = arith.constant 0 : index
    %12 = vector.load %arg5[%c0_9, %c0_10] : memref<1x128xf32, #tpu.memory_space<vmem>>, vector<1x128xf32>
    %13 = vector.broadcast %12 : vector<1x128xf32> to vector<8x128xf32>
    %14 = arith.addf %11, %13 : vector<8x128xf32>
    %cst_11 = arith.constant 0.000000e+00 : f32
    %15 = vector.broadcast %cst_11 : f32 to vector<8x128xf32>
    %16 = arith.maximumf %14, %15 : vector<8x128xf32>
    %17 = arith.truncf %16 : vector<8x128xf32> to vector<8x128xbf16>
    %c0_12 = arith.constant 0 : index
    %c0_13 = arith.constant 0 : index
    %18 = vector.load %arg6[%c0_12, %c0_13] : memref<128x64xbf16, #tpu.memory_space<vmem>>, vector<128x64xbf16>
    %cst_14 = arith.constant dense<0.000000e+00> : vector<8x64xf32>
    %19 = tpu.matmul %17, %18, %cst_14 {dimension_numbers = #tpu.dot_dimension_numbers<[1], [0], [0], [1], [0, 0, 1, 1], [], []>} : vector<8x128xbf16>, vector<128x64xbf16>, vector<8x64xf32> -> vector<8x64xf32>
    %c0_15 = arith.constant 0 : index
    %c0_16 = arith.constant 0 : index
    %20 = vector.load %arg7[%c0_15, %c0_16] : memref<1x64xf32, #tpu.memory_space<vmem>>, vector<1x64xf32>
    %21 = vector.broadcast %20 : vector<1x64xf32> to vector<8x64xf32>
    %22 = arith.addf %19, %21 : vector<8x64xf32>
    %cst_17 = arith.constant 0.000000e+00 : f32
    %23 = vector.broadcast %cst_17 : f32 to vector<8x64xf32>
    %24 = arith.maximumf %22, %23 : vector<8x64xf32>
    %25 = arith.truncf %24 : vector<8x64xf32> to vector<8x64xbf16>
    %c0_18 = arith.constant 0 : index
    %c0_19 = arith.constant 0 : index
    %26 = vector.load %arg8[%c0_18, %c0_19] : memref<64x128xbf16, #tpu.memory_space<vmem>>, vector<64x128xbf16>
    %cst_20 = arith.constant dense<0.000000e+00> : vector<8x128xf32>
    %27 = tpu.matmul %25, %26, %cst_20 {dimension_numbers = #tpu.dot_dimension_numbers<[1], [0], [0], [1], [0, 0, 1, 1], [], []>} : vector<8x64xbf16>, vector<64x128xbf16>, vector<8x128xf32> -> vector<8x128xf32>
    %c0_21 = arith.constant 0 : index
    %c0_22 = arith.constant 0 : index
    %28 = vector.load %arg9[%c0_21, %c0_22] : memref<1x128xf32, #tpu.memory_space<vmem>>, vector<1x128xf32>
    %29 = vector.broadcast %28 : vector<1x128xf32> to vector<8x128xf32>
    %30 = arith.addf %27, %29 : vector<8x128xf32>
    %31 = vector.extract_strided_slice %30 {offsets = [0, 0], sizes = [8, 8], strides = [1, 1]} : vector<8x128xf32> to vector<8x8xf32>
    %c0_23 = arith.constant 0 : index
    %c0_24 = arith.constant 0 : index
    %32 = vector.load %arg10[%c0_23, %c0_24] : memref<8x8xf32, #tpu.memory_space<vmem>>, vector<8x8xf32>
    tpu.vector_store %arg10[%c0_23, %c0_24], %31 {strides = array<i32>} : memref<8x8xf32, #tpu.memory_space<vmem>>, vector<8x8xf32>,
    return
  }
  func.func @transform_0(%arg0: i32) -> (i32, i32) {
    %c0_i32 = arith.constant 0 : i32
    %c0_i32_0 = arith.constant 0 : i32
    return %arg0, %c0_i32 : i32, i32
  }
  func.func @transform_1(%arg0: i32) -> (i32, i32) {
    %c0_i32 = arith.constant 0 : i32
    %c0_i32_0 = arith.constant 0 : i32
    %c0_i32_1 = arith.constant 0 : i32
    return %c0_i32, %c0_i32_0 : i32, i32
  }
  func.func @transform_2(%arg0: i32) -> (i32, i32) {
    %c0_i32 = arith.constant 0 : i32
    %c0_i32_0 = arith.constant 0 : i32
    %c0_i32_1 = arith.constant 0 : i32
    return %c0_i32, %c0_i32_0 : i32, i32
  }
  func.func @transform_3(%arg0: i32) -> (i32, i32) {
    %c0_i32 = arith.constant 0 : i32
    %c0_i32_0 = arith.constant 0 : i32
    %c0_i32_1 = arith.constant 0 : i32
    return %c0_i32, %c0_i32_0 : i32, i32
  }
  func.func @transform_4(%arg0: i32) -> (i32, i32) {
    %c0_i32 = arith.constant 0 : i32
    %c0_i32_0 = arith.constant 0 : i32
    %c0_i32_1 = arith.constant 0 : i32
    return %c0_i32, %c0_i32_0 : i32, i32
  }
  func.func @transform_5(%arg0: i32) -> (i32, i32) {
    %c0_i32 = arith.constant 0 : i32
    %c0_i32_0 = arith.constant 0 : i32
    %c0_i32_1 = arith.constant 0 : i32
    return %c0_i32, %c0_i32_0 : i32, i32
  }
  func.func @transform_6(%arg0: i32) -> (i32, i32) {
    %c0_i32 = arith.constant 0 : i32
    %c0_i32_0 = arith.constant 0 : i32
    %c0_i32_1 = arith.constant 0 : i32
    return %c0_i32, %c0_i32_0 : i32, i32
  }
  func.func @transform_7(%arg0: i32) -> (i32, i32) {
    %c0_i32 = arith.constant 0 : i32
    %c0_i32_0 = arith.constant 0 : i32
    %c0_i32_1 = arith.constant 0 : i32
    return %c0_i32, %c0_i32_0 : i32, i32
  }
  func.func @transform_8(%arg0: i32) -> (i32, i32) {
    %c0_i32 = arith.constant 0 : i32
    %c0_i32_0 = arith.constant 0 : i32
    %c0_i32_1 = arith.constant 0 : i32
    return %c0_i32, %c0_i32_0 : i32, i32
  }
  func.func @transform_9(%arg0: i32) -> (i32, i32) {
    %c0_i32 = arith.constant 0 : i32
    %c0_i32_0 = arith.constant 0 : i32
    return %arg0, %c0_i32 : i32, i32
  }
}

</mosaic_0001>

<bundles_post_ra>
// kernel: tpu_custom_call.1
= control target key start
LH: loop header
LB: loop body
LE: loop exit
PB: predicated region body
PF: predicated region fallthrough
CT: control target
= control target key end

     0   :  { %14 = vsyncpa [#allocation3], 0  ;;  %s669_s0 = inlined_call_operand.hbm [shape: f32[8,10], index: 0, kind: input, shape index: {}]   ;;  %s670_s1 = inlined_call_operand.hbm [shape: bf16[10,128], index: 1, kind: input, shape index: {}]   ;;  %s671_s2 = inlined_call_operand.vmem [shape: f32[1,128], index: 2, kind: input, shape index: {}]   ;;  %s672_s3 = inlined_call_operand.vmem [shape: bf16[128,128], index: 3, kind: input, shape index: {}]   ;;  %s673_s4 = inlined_call_operand.vmem [shape: f32[1,128], index: 4, kind: input, shape index: {}]   ;;  %s674_s5 = inlined_call_operand.vmem [shape: bf16[128,64], index: 5, kind: input, shape index: {}]   ;;  %s675_s6 = inlined_call_operand.vmem [shape: f32[1,64], index: 6, kind: input, shape index: {}]   ;;  %s676_s7 = inlined_call_operand.vmem [shape: bf16[64,128], index: 7, kind: input, shape index: {}]   ;;  %s677_s8 = inlined_call_operand.vmem [shape: f32[1,128], index: 8, kind: input, shape index: {}]   ;;  %s678_s9 = inlined_call_operand.hbm [shape: f32[8,8], index: 9, kind: output, shape index: {}]  }
   0x1   :  { %15 = vsyncpa [#allocation6], 0 }
   0x2   :  { %16 = vsyncpa [#allocation4], 0  ;;  %s22_s11 = sshll.u32 %s669_s0, 4  ;;  %s533_s12 = smov [#allocation2]   ;;  %s23_s11 = int_to_ptr.hbm [resolvable:$true] %s22_s11 }
   0x3   :  { %s24_s13 = sshll.u32 %s533_s12, 4  ;;  %s32_s16 = sshll.u32 %s670_s1, 4  ;;  %s25_s13 = int_to_ptr.vmem [resolvable:$true] %s24_s13  ;;  %s33_s16 = int_to_ptr.hbm [resolvable:$true] %s32_s16 }
   0x4   :  { %27 = dma.hbm_to_vmem [thread:$0]  %s23_s11, 128, %s25_s13, [#allocation3]  }
   0x5   :  { %s534_s17 = smov [#allocation5]   ;;  %s535_s19 = smov 64  }
   0x6   :  { %s34_s18 = sshll.u32 %s534_s17, 4  ;;  %s536_s20 = smov 4   ;;  %s35_s18 = int_to_ptr.vmem [resolvable:$true] %s34_s18 }
   0x7   :  { %40 = dma.hbm_to_vmem [thread:$0]  %s33_s16, 128, %s35_s18, [#allocation6], %s535_s19, %s535_s19, %s536_s20  }
   0x8   :  { %527 = dma.done.wait [#allocation3], 128  }
   0x9   :  { %528 = vsyncadd [#allocation3], 4294967168 }
   0xa   :  { %529 = dma.done.wait [#allocation6], 128  }
   0xb   :  { %530 = vsyncadd [#allocation6], 4294967168  ;;  %v341_v0 = vld [vmem:[#allocation5] sm:$0xf]  ;;  %v425_v1 = vld [vmem:[#allocation5] sm:$0x10] }
   0xc   :  { %vm81_vm0 = vcmask 1044480   ;;  %v64_v2 = vld [vmem:[#allocation2] sm:$0xff]  ;;  %v342_v3 = vor.u32 %v425_v1, %v341_v0  ;;  %v433_v4 = vld [vmem:[%s672_s3 + $0x38] sm:$0xff]  ;;  %vm77_vm1 = vcmask 80896   ;;  %v432_v7 = vld [vmem:[%s672_s3 + $0x30] sm:$0xff]  ;;  %vm302_vm2 = vcmask 523264  }
   0xd   :  { %v65_v6 = vpack.c.bf16 %v64_v2, %v64_v2  ;;  %168 = vmatpush.bf16.msra.mxu1 %v433_v4  ;;  %v431_v8 = vld [vmem:[%s672_s3 + $0x28] sm:$0xff]  ;;  %v430_v9 = vld [vmem:[%s672_s3 + $0x20] sm:$0xff]  ;;  %v429_v10 = vld [vmem:[%s672_s3 + $0x18] sm:$0xff]  ;;  %s537_s19 = smov [#allocation7]   ;;  %vm319_vm3 = vcmask 64512  }
   0xe   :  { %v83_v5 = vsel %vm81_vm0, %v342_v3, 0  ;;  %v428_v11 = vld [vmem:[%s672_s3 + $0x10] sm:$0xff]  ;;  %v427_v12 = vld [vmem:[%s672_s3 + $0x8] sm:$0xff]  ;;  %v426_v13 = vld [vmem:[%s672_s3] sm:$0xff]  ;;  %s326_s20 = sshll.u32 %s537_s19, 4  ;;  %s328_s3 = sshll.u32 %s678_s9, 4  ;;  %s327_s20 = int_to_ptr.vmem [resolvable:$true] %s326_s20  ;;  %s329_s3 = int_to_ptr.hbm [resolvable:$true] %s328_s3 }
   0xf   :  { %92 = vmatpush.bf16.msra.mxu0 %v83_v5  ;;  %v441_v14 = vld [vmem:[%s674_s5 + $0x38] sm:$0xff]  ;;  %v440_v15 = vld [vmem:[%s674_s5 + $0x30] sm:$0xff]  ;;  %v439_v16 = vld [vmem:[%s674_s5 + $0x28] sm:$0xff] }
  0x10   :  { %251 = vmatpush.bf16.msra.mxu2 %v441_v14  ;;  %v438_v17 = vld [vmem:[%s674_s5 + $0x20] sm:$0xff]  ;;  %v437_v18 = vld [vmem:[%s674_s5 + $0x18] sm:$0xff]  ;;  %v436_v19 = vld [vmem:[%s674_s5 + $0x10] sm:$0xff] }
  0x11   :  { %169 = vmatpush.bf16.msra.mxu1 %v432_v7  ;;  %v451_v20 = vld [vmem:[%s671_s2] ss:$0 sm:$0xff]  ;;  %v435_v26 = vld [vmem:[%s674_s5 + $0x8] sm:$0xff]  ;;  %v445_v28 = vld [vmem:[%s676_s7 + $0x18] sm:$0xff] }
  0x12   :  { %343 = vmatmul.msk.bf16.vlgmr.msra.gmra.mxu0 %vm77_vm1, %v65_v6  ;;  %v434_v27 = vld [vmem:[%s674_s5] sm:$0xff]  ;;  %310 = vmatpush.bf16.msra.mxu3 %v445_v28  ;;  %v444_v29 = vld [vmem:[%s676_s7 + $0x10] sm:$0xff]  ;;  %v443_v36 = vld [vmem:[%s676_s7 + $0x8] sm:$0xff] }
  0x13   :  { %v452_v30 = vld [vmem:[%s673_s4] ss:$0 sm:$0xff] }
  0x14   :  { %252 = vmatpush.bf16.msra.mxu2 %v440_v15  ;;  %v442_v37 = vld [vmem:[%s676_s7] sm:$0xff] }
  0x15   :  { %170 = vmatpush.bf16.msra.mxu1 %v431_v8  ;;  %v453_v38 = vld [vmem:[%s675_s6] ss:$0 sm:$0xff] }
  0x16   :  { %311 = vmatpush.bf16.msra.mxu3 %v444_v29  ;;  %v454_v44 = vld [vmem:[%s677_s8] ss:$0 sm:$0xff] }
  0x18   :  { %253 = vmatpush.bf16.msra.mxu2 %v439_v16 }
  0x19   :  { %171 = vmatpush.bf16.msra.mxu1 %v430_v9 }
  0x1a   :  { %312 = vmatpush.bf16.msra.mxu3 %v443_v36 }
  0x1c   :  { %254 = vmatpush.bf16.msra.mxu2 %v438_v17 }
  0x1d   :  { %172 = vmatpush.bf16.msra.mxu1 %v429_v10 }
  0x1e   :  { %313 = vmatpush.bf16.msra.mxu3 %v442_v37 }
  0x20   :  { %255 = vmatpush.bf16.msra.mxu2 %v437_v18 }
  0x21   :  { %173 = vmatpush.bf16.msra.mxu1 %v428_v11 }
  0x24   :  { %256 = vmatpush.bf16.msra.mxu2 %v436_v19 }
  0x25   :  { %174 = vmatpush.bf16.msra.mxu1 %v427_v12 }
  0x28   :  { %257 = vmatpush.bf16.msra.mxu2 %v435_v26 }
  0x29   :  { %175 = vmatpush.bf16.msra.mxu1 %v426_v13 }
  0x2c   :  { %258 = vmatpush.bf16.msra.mxu2 %v434_v27 }
  0x8f   :  { %v94_v21 = vpop.f32.mrf.mxu0 }
  0x90   :  { %v95_v22 = vadd.f32 %v451_v20, %v94_v21 }
  0x92   :  { %v98_v23 = vmax.f32 %v95_v22, 0.0 }
  0x94   :  { %v99_v24 = vpack.c.bf16 %v98_v23, %v98_v23 }
  0x96   :  { %176 = vmatmul.bf16.vlgmr.msra.gmra.mxu1 %v99_v24 }
  0x97   :  { %v96_v25 = vpop.f32.mrf.mxu0 }
 0x113   :  { %v177_v31 = vpop.f32.mrf.mxu1 }
 0x114   :  { %v178_v32 = vadd.f32 %v452_v30, %v177_v31 }
 0x116   :  { %v181_v33 = vmax.f32 %v178_v32, 0.0 }
 0x118   :  { %v182_v34 = vpack.c.bf16 %v181_v33, %v181_v33 }
 0x11a   :  { %259 = vmatmul.bf16.vlgmr.msra.gmra.mxu2 %v182_v34 }
 0x11b   :  { %v179_v35 = vpop.f32.mrf.mxu1 }
 0x19d   :  { %v260_v39 = vpop.f32.mrf.mxu2 }
 0x19e   :  { %v261_v40 = vadd.f32 %v453_v38, %v260_v39 }
 0x1a0   :  { %v264_v41 = vmax.f32 %v261_v40, 0.0 }
 0x1a2   :  { %v265_v42 = vpack.c.bf16 %v264_v41, %v264_v41 }
 0x1a4   :  { %424 = vmatmul.msk.bf16.vlgmr.msra.gmra.mxu3 %vm302_vm2, %v265_v42 }
 0x1a5   :  { %v262_v43 = vpop.f32.mrf.mxu2 }
 0x227   :  { %v315_v45 = vpop.f32.mrf.mxu3 }
 0x228   :  { %v316_v46 = vadd.f32 %v454_v44, %v315_v45 }
 0x22a   :  { %320 = vst.msk [vmem:[#allocation7] sm:$0xff] %vm319_vm3, %v316_v46 }
 0x22b   :  { %331 = dma.vmem_to_hbm [thread:$0]  %s327_s20, 128, %s329_s3, [#allocation4]  }
 0x22f   :  { %v317_v47 = vpop.f32.mrf.mxu3 }
 0x230   :  { %531 = dma.done.wait [#allocation4], 128  }
 0x231   :  { %532 = vsyncadd [#allocation4], 4294967168 }
 0x232   :  { %336 = vsyncpa [#allocation3], 1 }
 0x233   :  { %337 = vsyncpa [#allocation6], 1 }
 0x234   :  { %338 = vsyncpa [#allocation4], 1 }

</bundles_post_ra>
